<compile_context>
chip_gen: v7x
topology: tpu7x:2x2x1
jax: 0.10.0
libtpu: 0.0.40
codegen_flags: <defaults>
</compile_context>

<pallas_src>
import functools

import numpy as np
import jax
import jax.numpy as jnp
from jax.experimental import pallas as pl
from jax.experimental.pallas import tpu as pltpu

_LN_EPS = 1e-5                    # PyTorch nn.LayerNorm default
_GELU_C = 0.7978845608028654      # sqrt(2/pi)


def _round_up(x, m):
    return (x + m - 1) // m * m


def _pick_chunk(bp, target=256):
    """Largest multiple-of-8 divisor of bp that is <= target (bp if bp<=target)."""
    if bp <= target:
        return bp
    best = 8
    for c in range(8, target + 1, 8):
        if bp % c == 0:
            best = c
    return best


def _gelu(x):
    # tanh-approx GELU: transcendental goes to the EUP slot, few VALU ops.
    return 0.5 * x * (1.0 + jnp.tanh(_GELU_C * (x + 0.044715 * x * x * x)))


def _layernorm(x, gamma, beta):
    # gamma/beta stay (1, H); implicit broadcasting (no materialized broadcast).
    mu = jnp.mean(x, axis=-1, keepdims=True)
    xc = x - mu
    var = jnp.mean(xc * xc, axis=-1, keepdims=True)
    return xc * jax.lax.rsqrt(var + _LN_EPS) * gamma + beta


# ---------------------------------------------------------------------------
# Fused kernel: all MixerBlocks + pre-head norm + masked mean pooling + head
# ---------------------------------------------------------------------------
def mixer_stack_kernel(x_ref,
                       g1_ref, b1_ref, tw1t_ref, tb1_ref, tw2t_ref, tb2_ref,
                       g2_ref, b2_ref, cw1_ref, cb1_ref, cw2_ref, cb2_ref,
                       pool_ref, hg_ref, hb_ref, hw_ref, hwb_ref,
                       logits_ref,
                       acc_ref,
                       *, block_b, chunk_rows):
    """Grid = (batch_tiles, n_blocks); block axis innermost / arbitrary.

    The (block_b*P, H) activation slab lives in `acc_ref` (f32) across the block
    axis; per-block weights (bf16 matmul operands, f32 biases) are streamed.
    """
    blk = pl.program_id(1)
    n_blk = pl.num_programs(1)
    BP, H = acc_ref.shape
    P = BP // block_b

    @pl.when(blk == 0)
    def _init():
        acc_ref[...] = x_ref[...].astype(jnp.float32)

    # --- token mixing: per-sample loop with bounded live ranges -------------
    # Token weights are pre-transposed host-side, so both matmuls are plain
    # row-major contractions (no in-kernel transpose).
    @pl.loop(0, block_b)
    def _token(bi):
        r0 = pl.multiple_of(bi * P, P)
        x = acc_ref[pl.ds(r0, P), :]                              # (P, H) f32
        y = _layernorm(x, g1_ref[...], b1_ref[...]).astype(jnp.bfloat16)
        ht = _gelu(jnp.dot(tw1t_ref[...], y,
                           preferred_element_type=jnp.float32)
                   + tb1_ref[...])                                # (T, H) f32
        tok = jnp.dot(tw2t_ref[...], ht.astype(jnp.bfloat16),
                      preferred_element_type=jnp.float32) + tb2_ref[...]
        acc_ref[pl.ds(r0, P), :] = x + tok

    # --- channel mixing: row-chunked over the slab ---------------------------
    n_chunks = BP // chunk_rows

    @pl.loop(0, n_chunks)
    def _channel(ci):
        r0 = pl.multiple_of(ci * chunk_rows, chunk_rows)
        x = acc_ref[pl.ds(r0, chunk_rows), :]                     # (chunk, H) f32
        y = _layernorm(x, g2_ref[...], b2_ref[...]).astype(jnp.bfloat16)
        h = _gelu(jnp.dot(y, cw1_ref[...],
                          preferred_element_type=jnp.float32)
                  + cb1_ref[...])                                 # (chunk, C) f32
        acc_ref[pl.ds(r0, chunk_rows), :] = (
            x + jnp.dot(h.astype(jnp.bfloat16), cw2_ref[...],
                        preferred_element_type=jnp.float32) + cb2_ref[...])

    # --- last block step: pre-head LN + masked-mean pooling (MXU) + head ----
    @pl.when(blk == n_blk - 1)
    def _head():
        xn = _layernorm(acc_ref[...], hg_ref[...], hb_ref[...])  # (BP, H) f32
        # Block-diagonal pooling matrix: 1/n_patches on real-patch rows, 0 on
        # alignment padding -> masked mean as one matmul (no sublane reduce).
        pooled = jnp.dot(pool_ref[...], xn,
                         preferred_element_type=jnp.float32)      # (block_b, H)
        logits_ref[...] = (jnp.dot(pooled, hw_ref[...],
                                   preferred_element_type=jnp.float32)
                           + hwb_ref[...]).astype(logits_ref.dtype)


# ---------------------------------------------------------------------------
# pallas_call wrapper
# ---------------------------------------------------------------------------
_W_ORDER = ("g1", "b1", "tw1t", "tb1", "tw2t", "tb2",
            "g2", "b2", "cw1", "cb1", "cw2", "cb2")


def mixer_stack_call(x_flat, stacked, pool_mat, head_g, head_b, head_w, head_wb,
                     *, block_b, p_pad, chunk_rows):
    BP_total, H = x_flat.shape
    BP = block_b * p_pad
    n_btiles = BP_total // BP
    b_pad = n_btiles * block_b
    n_blocks = stacked["g1"].shape[0]
    c_pad = head_w.shape[1]

    w_arrays = [stacked[k] for k in _W_ORDER]
    # All stacked weights are 3-D (n_blocks, r, c): stream block `l` each step.
    w_specs = [pl.BlockSpec((None,) + a.shape[1:], lambda b, l: (l, 0, 0))
               for a in w_arrays]
    fixed_specs = [
        pl.BlockSpec(pool_mat.shape, lambda b, l: (0, 0)),
        pl.BlockSpec(head_g.shape, lambda b, l: (0, 0)),
        pl.BlockSpec(head_b.shape, lambda b, l: (0, 0)),
        pl.BlockSpec(head_w.shape, lambda b, l: (0, 0)),
        pl.BlockSpec(head_wb.shape, lambda b, l: (0, 0)),
    ]
    in_specs = ([pl.BlockSpec((BP, H), lambda b, l: (b, 0))]
                + w_specs + fixed_specs)

    kernel = functools.partial(mixer_stack_kernel,
                               block_b=block_b, chunk_rows=chunk_rows)

    # VMEM budget: double-buffered streamed weights + x tile + resident slab +
    # fixed head inputs + headroom for loop live values; clamp to 56 MiB so it
    # also fits one v7x TensorCore (64 MiB).
    def _blk_bytes(a):
        return int(np.prod(a.shape[1:])) * a.dtype.itemsize
    stream_bytes = sum(_blk_bytes(a) for a in w_arrays)
    fixed_bytes = sum(int(np.prod(a.shape)) * a.dtype.itemsize
                      for a in (pool_mat, head_g, head_b, head_w, head_wb))
    est = (2 * stream_bytes
           + 2 * x_flat.dtype.itemsize * BP * H
           + 4 * BP * H                              # acc scratch (f32)
           + fixed_bytes
           + 2 * 4 * block_b * c_pad                 # output tile
           + 8 * 1024 * 1024)                        # chunked-MLP live values
    vmem_limit = int(min(max(est, 16 * 1024 * 1024), 56 * 1024 * 1024))

    return pl.pallas_call(
        kernel,
        out_shape=jax.ShapeDtypeStruct((b_pad, c_pad), jnp.float32),
        grid=(n_btiles, n_blocks),
        in_specs=in_specs,
        out_specs=pl.BlockSpec((block_b, c_pad), lambda b, l: (b, 0)),
        scratch_shapes=[pltpu.VMEM((BP, H), jnp.float32)],
        compiler_params=pltpu.CompilerParams(
            # On v7x, >=2 batch tiles lets the 'parallel' axis use both TCs.
            dimension_semantics=("parallel", "arbitrary"),
            vmem_limit_bytes=vmem_limit),
    )(x_flat, *w_arrays, pool_mat, head_g, head_b, head_w, head_wb)


# ---------------------------------------------------------------------------
# Parameters (deterministic nn.Linear-style uniform init; LayerNorm ones/zeros)
# ---------------------------------------------------------------------------
def _linear(key, fan_in, fan_out):
    kw, kb = jax.random.split(key)
    bound = 1.0 / np.sqrt(fan_in)
    w = jax.random.uniform(kw, (fan_in, fan_out), jnp.float32, -bound, bound)
    b = jax.random.uniform(kb, (1, fan_out), jnp.float32, -bound, bound)
    return w, b


def init_params(key, *, n_patches, hidden_dim, tokens_mlp_dim,
                channels_mlp_dim, n_classes, n_blocks):
    params = {"blocks": []}
    for _ in range(n_blocks):
        key, k1, k2, k3, k4 = jax.random.split(key, 5)
        tw1, tb1 = _linear(k1, n_patches, tokens_mlp_dim)
        tw2, tb2 = _linear(k2, tokens_mlp_dim, n_patches)
        cw1, cb1 = _linear(k3, hidden_dim, channels_mlp_dim)
        cw2, cb2 = _linear(k4, channels_mlp_dim, hidden_dim)
        params["blocks"].append(dict(
            g1=jnp.ones((1, hidden_dim), jnp.float32),
            b1=jnp.zeros((1, hidden_dim), jnp.float32),
            tw1=tw1, tb1=tb1, tw2=tw2, tb2=tb2,
            g2=jnp.ones((1, hidden_dim), jnp.float32),
            b2=jnp.zeros((1, hidden_dim), jnp.float32),
            cw1=cw1, cb1=cb1, cw2=cw2, cb2=cb2,
        ))
    key, kh = jax.random.split(key)
    hw, hb = _linear(kh, hidden_dim, n_classes)
    params["head_g"] = jnp.ones((1, hidden_dim), jnp.float32)
    params["head_b"] = jnp.zeros((1, hidden_dim), jnp.float32)
    params["head_w"] = hw
    params["head_wb"] = hb
    return params


def stack_block_params(blocks, *, p_pad):
    """Stack per-block weights along a leading n_blocks axis.

    Token-mix weights are pre-transposed and patch-padded with zero rows/cols;
    matmul operands (tw1t, tw2t, cw1, cw2) are cast to bf16 for the MXU
    (zero padding is exact in bf16). Biases / LN params stay f32.
    """
    P = blocks[0]["tw1"].shape[0]
    pad_r = p_pad - P

    def stk(fn):
        return jnp.stack([fn(b) for b in blocks])

    return {
        "g1": stk(lambda b: b["g1"]),
        "b1": stk(lambda b: b["b1"]),
        "tw1t": stk(lambda b: jnp.pad(b["tw1"].T, ((0, 0), (0, pad_r)))
                    .astype(jnp.bfloat16)),                          # (T, P_pad)
        "tb1":  stk(lambda b: b["tb1"].reshape(-1, 1)),               # (T, 1)
        "tw2t": stk(lambda b: jnp.pad(b["tw2"].T, ((0, pad_r), (0, 0)))
                    .astype(jnp.bfloat16)),                          # (P_pad, T)
        "tb2":  stk(lambda b: jnp.pad(b["tb2"].reshape(-1, 1),
                                      ((0, pad_r), (0, 0)))),         # (P_pad, 1)
        "g2": stk(lambda b: b["g2"]),
        "b2": stk(lambda b: b["b2"]),
        "cw1": stk(lambda b: b["cw1"].astype(jnp.bfloat16)),          # (H, C)
        "cb1": stk(lambda b: b["cb1"]),                               # (1, C)
        "cw2": stk(lambda b: b["cw2"].astype(jnp.bfloat16)),          # (C, H)
        "cb2": stk(lambda b: b["cb2"]),                               # (1, H)
    }


# ---------------------------------------------------------------------------
# Full forward (host glue: subvideo split / zero-pad / stack / per-frame expand)
# ---------------------------------------------------------------------------
def mlp_mixer_forward(frame_features, subvideo_lengths, params, *,
                      n_patches, block_b=None):
    H = frame_features.shape[-1]
    n_classes = params["head_w"].shape[1]

    # split frames into subvideos, zero-pad each to n_patches (as in torch)
    subvideos = []
    off = 0
    for L in subvideo_lengths:
        assert L <= n_patches, "subvideo frames exceed n_patches"
        sv = frame_features[off:off + L]
        pad = jnp.zeros((n_patches - L, H), frame_features.dtype)
        subvideos.append(jnp.concatenate([sv, pad], axis=0))
        off += L
    x = jnp.stack(subvideos)                                  # (B, n_patches, H)
    B = x.shape[0]

    # alignment padding: patches -> multiple of 8; batch -> multiple of block_b
    p_pad = _round_up(n_patches, 8)
    if p_pad != n_patches:
        x = jnp.pad(x, ((0, 0), (0, p_pad - n_patches), (0, 0)))
    if block_b is None:
        block_b = B if B <= 8 else 8
    b_pad = _round_up(B, block_b)
    # output tile (block_b, c_pad) must be (8,128)-friendly or full-extent
    assert block_b == b_pad or block_b % 8 == 0
    if b_pad != B:
        x = jnp.pad(x, ((0, b_pad - B), (0, 0), (0, 0)))

    # lane-dense 2-D activation slab (free contiguous reshape, outside kernel)
    x_flat = x.reshape(b_pad * p_pad, H)
    BP = block_b * p_pad
    chunk_rows = _pick_chunk(BP)

    stacked = stack_block_params(params["blocks"], p_pad=p_pad)

    # Block-diagonal pooling matrix: 1/n_patches on the real-patch rows of each
    # sample (matches torch mean over n_patches incl. short-subvideo zero pad),
    # 0 on alignment-padding rows.
    row_w = (np.arange(p_pad) < n_patches).astype(np.float32) / float(n_patches)
    pool_np = np.zeros((block_b, BP), np.float32)
    for bi in range(block_b):
        pool_np[bi, bi * p_pad:(bi + 1) * p_pad] = row_w
    pool_mat = jnp.asarray(pool_np)

    # classifier weights: pad classes to a lane-dense multiple of 128
    c_pad = _round_up(n_classes, 128)
    head_w = jnp.pad(params["head_w"], ((0, 0), (0, c_pad - n_classes)))
    head_wb = jnp.pad(params["head_wb"], ((0, 0), (0, c_pad - n_classes)))

    logits_pad = mixer_stack_call(
        x_flat, stacked, pool_mat,
        params["head_g"], params["head_b"], head_w, head_wb,
        block_b=block_b, p_pad=p_pad, chunk_rows=chunk_rows)  # (b_pad, c_pad)

    logits = logits_pad[:B, :n_classes]                       # (B, n_classes)

    # expand per-subvideo logits back to per-frame
    idx = np.repeat(np.arange(len(subvideo_lengths)), subvideo_lengths)
    return logits[idx]                                        # (total_frames, C)


# ---------------------------------------------------------------------------
if __name__ == "__main__":
    # Small, module-consistent shapes (original: n_patches=125, hidden=512)
    n_patches = 8
    hidden_dim = 32
    tokens_mlp_dim = 16
    channels_mlp_dim = 64
    n_classes = 10
    n_blocks = 2
    subvideo_lengths = [5, 7]
    total_frames = sum(subvideo_lengths)

    key = jax.random.PRNGKey(0)
    key, kf, kp = jax.random.split(key, 3)
    frame_features = jax.random.normal(kf, (total_frames, hidden_dim), jnp.float32)
    params = init_params(kp, n_patches=n_patches, hidden_dim=hidden_dim,
                         tokens_mlp_dim=tokens_mlp_dim,
                         channels_mlp_dim=channels_mlp_dim,
                         n_classes=n_classes, n_blocks=n_blocks)

    out = mlp_mixer_forward(frame_features, subvideo_lengths, params,
                            n_patches=n_patches)
    out = jax.block_until_ready(out)

    assert out.shape == (total_frames, n_classes), out.shape
    assert bool(jnp.all(jnp.isfinite(out)))
    # frames of the same subvideo share identical logits (expand semantics)
    assert bool(jnp.allclose(out[0], out[subvideo_lengths[0] - 1]))
    print("KERNEL_OK")
</pallas_src>

<mosaic_0001>
module attributes {stable_mosaic.version = 11 : i64} {
  func.func @mixer_stack_kernel(%arg0: i32, %arg1: i32, %arg2: memref<16x32xf32, #tpu.memory_space<vmem>>, %arg3: memref<1x1x32xf32, #tpu.memory_space<vmem>>, %arg4: memref<1x1x32xf32, #tpu.memory_space<vmem>>, %arg5: memref<1x16x8xbf16, #tpu.memory_space<vmem>>, %arg6: memref<1x16x1xf32, #tpu.memory_space<vmem>>, %arg7: memref<1x8x16xbf16, #tpu.memory_space<vmem>>, %arg8: memref<1x8x1xf32, #tpu.memory_space<vmem>>, %arg9: memref<1x1x32xf32, #tpu.memory_space<vmem>>, %arg10: memref<1x1x32xf32, #tpu.memory_space<vmem>>, %arg11: memref<1x32x64xbf16, #tpu.memory_space<vmem>>, %arg12: memref<1x1x64xf32, #tpu.memory_space<vmem>>, %arg13: memref<1x64x32xbf16, #tpu.memory_space<vmem>>, %arg14: memref<1x1x32xf32, #tpu.memory_space<vmem>>, %arg15: memref<2x16xf32, #tpu.memory_space<vmem>>, %arg16: memref<1x32xf32, #tpu.memory_space<vmem>>, %arg17: memref<1x32xf32, #tpu.memory_space<vmem>>, %arg18: memref<32x128xf32, #tpu.memory_space<vmem>>, %arg19: memref<1x128xf32, #tpu.memory_space<vmem>>, %arg20: memref<2x128xf32, #tpu.memory_space<vmem>>, %arg21: memref<16x32xf32, #tpu.memory_space<vmem>>) attributes {dimension_semantics = [#tpu.dimension_semantics<parallel>, #tpu.dimension_semantics<arbitrary>], iteration_bounds = array<i64: 1, 2>, scalar_prefetch = 0 : i64, scratch_operands = 1 : i64, tpu.core_type = #tpu.core_type<tc>, window_params = [{transform_indices = @transform_0, window_bounds = array<i64: 16, 32>}, {transform_indices = @transform_1, window_bounds = array<i64: 1, 1, 32>}, {transform_indices = @transform_2, window_bounds = array<i64: 1, 1, 32>}, {transform_indices = @transform_3, window_bounds = array<i64: 1, 16, 8>}, {transform_indices = @transform_4, window_bounds = array<i64: 1, 16, 1>}, {transform_indices = @transform_5, window_bounds = array<i64: 1, 8, 16>}, {transform_indices = @transform_6, window_bounds = array<i64: 1, 8, 1>}, {transform_indices = @transform_7, window_bounds = array<i64: 1, 1, 32>}, {transform_indices = @transform_8, window_bounds = array<i64: 1, 1, 32>}, {transform_indices = @transform_9, window_bounds = array<i64: 1, 32, 64>}, {transform_indices = @transform_10, window_bounds = array<i64: 1, 1, 64>}, {transform_indices = @transform_11, window_bounds = array<i64: 1, 64, 32>}, {transform_indices = @transform_12, window_bounds = array<i64: 1, 1, 32>}, {pipeline_mode = #tpu.pipeline_mode<synchronous>, transform_indices = @transform_13, window_bounds = array<i64: 2, 16>}, {pipeline_mode = #tpu.pipeline_mode<synchronous>, transform_indices = @transform_14, window_bounds = array<i64: 1, 32>}, {pipeline_mode = #tpu.pipeline_mode<synchronous>, transform_indices = @transform_15, window_bounds = array<i64: 1, 32>}, {pipeline_mode = #tpu.pipeline_mode<synchronous>, transform_indices = @transform_16, window_bounds = array<i64: 32, 128>}, {pipeline_mode = #tpu.pipeline_mode<synchronous>, transform_indices = @transform_17, window_bounds = array<i64: 1, 128>}, {transform_indices = @transform_18, window_bounds = array<i64: 2, 128>}]} {
    %c0_i32 = arith.constant 0 : i32
    %0 = arith.cmpi eq, %arg1, %c0_i32 : i32
    %1 = arith.extui %0 : i1 to i32
    %c0_i32_0 = arith.constant 0 : i32
    %2 = arith.cmpi ne, %1, %c0_i32_0 : i32
    scf.if %2 {
      %c0_38 = arith.constant 0 : index
      %c0_39 = arith.constant 0 : index
      %69 = vector.load %arg2[%c0_38, %c0_39] : memref<16x32xf32, #tpu.memory_space<vmem>>, vector<16x32xf32>
      %c0_40 = arith.constant 0 : index
      %c0_41 = arith.constant 0 : index
      %70 = vector.load %arg21[%c0_40, %c0_41] : memref<16x32xf32, #tpu.memory_space<vmem>>, vector<16x32xf32>
      tpu.vector_store %arg21[%c0_40, %c0_41], %69 {strides = array<i32>} : memref<16x32xf32, #tpu.memory_space<vmem>>, vector<16x32xf32>,
    } else {
    }
    %c0_i32_1 = arith.constant 0 : i32
    %c2_i32 = arith.constant 2 : i32
    %3 = arith.addi %c0_i32_1, %c2_i32 : i32
    %c1_i32 = arith.constant 1 : i32
    scf.for %arg22 = %c0_i32_1 to %3 step %c1_i32  : i32 {
      %c1_i32_38 = arith.constant 1 : i32
      %69 = arith.muli %arg22, %c1_i32_38 : i32
      %c0_i32_39 = arith.constant 0 : i32
      %70 = arith.addi %c0_i32_39, %69 : i32
      %c8_i32 = arith.constant 8 : i32
      %71 = arith.muli %70, %c8_i32 : i32
      %72 = tpu.assume_multiple %71, 8 : i32
      %73 = arith.index_cast %72 : i32 to index
      %c0_40 = arith.constant 0 : index
      %74 = vector.load %arg21[%73, %c0_40] : memref<16x32xf32, #tpu.memory_space<vmem>>, vector<8x32xf32>
      %c0_41 = arith.constant 0 : index
      %c0_42 = arith.constant 0 : index
      %c0_43 = arith.constant 0 : index
      %75 = vector.load %arg3[%c0_41, %c0_42, %c0_43] : memref<1x1x32xf32, #tpu.memory_space<vmem>>, vector<1x1x32xf32>
      %76 = vector.shape_cast %75 : vector<1x1x32xf32> to vector<1x32xf32>
      %c0_44 = arith.constant 0 : index
      %c0_45 = arith.constant 0 : index
      %c0_46 = arith.constant 0 : index
      %77 = vector.load %arg4[%c0_44, %c0_45, %c0_46] : memref<1x1x32xf32, #tpu.memory_space<vmem>>, vector<1x1x32xf32>
      %78 = vector.shape_cast %77 : vector<1x1x32xf32> to vector<1x32xf32>
      %cst_47 = arith.constant dense<0.000000e+00> : vector<8xf32>
      %79 = vector.multi_reduction <add>, %74, %cst_47 [1] : vector<8x32xf32> to vector<8xf32>
      %80 = vector.shape_cast %79 : vector<8xf32> to vector<8x1xf32>
      %cst_48 = arith.constant 3.200000e+01 : f32
      %81 = vector.broadcast %cst_48 : f32 to vector<8x1xf32>
      %82 = arith.divf %80, %81 : vector<8x1xf32>
      %83 = vector.broadcast %82 : vector<8x1xf32> to vector<8x32xf32>
      %84 = arith.subf %74, %83 : vector<8x32xf32>
      %85 = arith.mulf %84, %84 : vector<8x32xf32>
      %cst_49 = arith.constant dense<0.000000e+00> : vector<8xf32>
      %86 = vector.multi_reduction <add>, %85, %cst_49 [1] : vector<8x32xf32> to vector<8xf32>
      %87 = vector.shape_cast %86 : vector<8xf32> to vector<8x1xf32>
      %cst_50 = arith.constant 3.200000e+01 : f32
      %88 = vector.broadcast %cst_50 : f32 to vector<8x1xf32>
      %89 = arith.divf %87, %88 : vector<8x1xf32>
      %cst_51 = arith.constant 9.99999974E-6 : f32
      %90 = vector.broadcast %cst_51 : f32 to vector<8x1xf32>
      %91 = arith.addf %89, %90 : vector<8x1xf32>
      %92 = math.rsqrt %91 : vector<8x1xf32>
      %93 = vector.broadcast %92 : vector<8x1xf32> to vector<8x32xf32>
      %94 = arith.mulf %84, %93 : vector<8x32xf32>
      %95 = vector.broadcast %76 : vector<1x32xf32> to vector<8x32xf32>
      %96 = arith.mulf %94, %95 : vector<8x32xf32>
      %97 = vector.broadcast %78 : vector<1x32xf32> to vector<8x32xf32>
      %98 = arith.addf %96, %97 : vector<8x32xf32>
      %99 = arith.truncf %98 : vector<8x32xf32> to vector<8x32xbf16>
      %c0_52 = arith.constant 0 : index
      %c0_53 = arith.constant 0 : index
      %c0_54 = arith.constant 0 : index
      %100 = vector.load %arg5[%c0_52, %c0_53, %c0_54] : memref<1x16x8xbf16, #tpu.memory_space<vmem>>, vector<1x16x8xbf16>
      %101 = vector.shape_cast %100 : vector<1x16x8xbf16> to vector<16x8xbf16>
      %cst_55 = arith.constant dense<0.000000e+00> : vector<16x32xf32>
      %102 = tpu.matmul %101, %99, %cst_55 {dimension_numbers = #tpu.dot_dimension_numbers<[1], [0], [0], [1], [0, 0, 1, 1], [], []>} : vector<16x8xbf16>, vector<8x32xbf16>, vector<16x32xf32> -> vector<16x32xf32>
      %c0_56 = arith.constant 0 : index
      %c0_57 = arith.constant 0 : index
      %c0_58 = arith.constant 0 : index
      %103 = vector.load %arg6[%c0_56, %c0_57, %c0_58] : memref<1x16x1xf32, #tpu.memory_space<vmem>>, vector<1x16x1xf32>
      %104 = vector.shape_cast %103 : vector<1x16x1xf32> to vector<16x1xf32>
      %105 = vector.broadcast %104 : vector<16x1xf32> to vector<16x32xf32>
      %106 = arith.addf %102, %105 : vector<16x32xf32>
      %cst_59 = arith.constant 5.000000e-01 : f32
      %107 = vector.broadcast %cst_59 : f32 to vector<16x32xf32>
      %108 = arith.mulf %107, %106 : vector<16x32xf32>
      %cst_60 = arith.constant 4.471500e-02 : f32
      %109 = vector.broadcast %cst_60 : f32 to vector<16x32xf32>
      %110 = arith.mulf %109, %106 : vector<16x32xf32>
      %111 = arith.mulf %110, %106 : vector<16x32xf32>
      %112 = arith.mulf %111, %106 : vector<16x32xf32>
      %113 = arith.addf %106, %112 : vector<16x32xf32>
      %cst_61 = arith.constant 0.797884583 : f32
      %114 = vector.broadcast %cst_61 : f32 to vector<16x32xf32>
      %115 = arith.mulf %114, %113 : vector<16x32xf32>
      %116 = math.tanh %115 : vector<16x32xf32>
      %cst_62 = arith.constant 1.000000e+00 : f32
      %117 = vector.broadcast %cst_62 : f32 to vector<16x32xf32>
      %118 = arith.addf %117, %116 : vector<16x32xf32>
      %119 = arith.mulf %108, %118 : vector<16x32xf32>
      %c0_63 = arith.constant 0 : index
      %c0_64 = arith.constant 0 : index
      %c0_65 = arith.constant 0 : index
      %120 = vector.load %arg7[%c0_63, %c0_64, %c0_65] : memref<1x8x16xbf16, #tpu.memory_space<vmem>>, vector<1x8x16xbf16>
      %121 = vector.shape_cast %120 : vector<1x8x16xbf16> to vector<8x16xbf16>
      %122 = arith.truncf %119 : vector<16x32xf32> to vector<16x32xbf16>
      %cst_66 = arith.constant dense<0.000000e+00> : vector<8x32xf32>
      %123 = tpu.matmul %121, %122, %cst_66 {dimension_numbers = #tpu.dot_dimension_numbers<[1], [0], [0], [1], [0, 0, 1, 1], [], []>} : vector<8x16xbf16>, vector<16x32xbf16>, vector<8x32xf32> -> vector<8x32xf32>
      %c0_67 = arith.constant 0 : index
      %c0_68 = arith.constant 0 : index
      %c0_69 = arith.constant 0 : index
      %124 = vector.load %arg8[%c0_67, %c0_68, %c0_69] : memref<1x8x1xf32, #tpu.memory_space<vmem>>, vector<1x8x1xf32>
      %125 = vector.shape_cast %124 : vector<1x8x1xf32> to vector<8x1xf32>
      %126 = vector.broadcast %125 : vector<8x1xf32> to vector<8x32xf32>
      %127 = arith.addf %123, %126 : vector<8x32xf32>
      %128 = arith.addf %74, %127 : vector<8x32xf32>
      %129 = arith.index_cast %72 : i32 to index
      %c0_70 = arith.constant 0 : index
      %130 = vector.load %arg21[%129, %c0_70] : memref<16x32xf32, #tpu.memory_space<vmem>>, vector<8x32xf32>
      tpu.vector_store %arg21[%129, %c0_70], %128 {strides = array<i32>} : memref<16x32xf32, #tpu.memory_space<vmem>>, vector<8x32xf32>,
    }
    %c2_i32_2 = arith.constant 2 : i32
    %c0_i32_3 = arith.constant 0 : i32
    %c1_i32_4 = arith.constant 1 : i32
    %4 = arith.muli %c0_i32_3, %c1_i32_4 : i32
    %c0_i32_5 = arith.constant 0 : i32
    %5 = arith.addi %c0_i32_5, %4 : i32
    %c16_i32 = arith.constant 16 : i32
    %6 = arith.muli %5, %c16_i32 : i32
    %7 = tpu.assume_multiple %6, 16 : i32
    %8 = arith.index_cast %7 : i32 to index
    %c0 = arith.constant 0 : index
    %9 = vector.load %arg21[%8, %c0] : memref<16x32xf32, #tpu.memory_space<vmem>>, vector<16x32xf32>
    %c0_6 = arith.constant 0 : index
    %c0_7 = arith.constant 0 : index
    %c0_8 = arith.constant 0 : index
    %10 = vector.load %arg9[%c0_6, %c0_7, %c0_8] : memref<1x1x32xf32, #tpu.memory_space<vmem>>, vector<1x1x32xf32>
    %11 = vector.shape_cast %10 : vector<1x1x32xf32> to vector<1x32xf32>
    %c0_9 = arith.constant 0 : index
    %c0_10 = arith.constant 0 : index
    %c0_11 = arith.constant 0 : index
    %12 = vector.load %arg10[%c0_9, %c0_10, %c0_11] : memref<1x1x32xf32, #tpu.memory_space<vmem>>, vector<1x1x32xf32>
    %13 = vector.shape_cast %12 : vector<1x1x32xf32> to vector<1x32xf32>
    %cst = arith.constant dense<0.000000e+00> : vector<16xf32>
    %14 = vector.multi_reduction <add>, %9, %cst [1] : vector<16x32xf32> to vector<16xf32>
    %15 = vector.shape_cast %14 : vector<16xf32> to vector<16x1xf32>
    %cst_12 = arith.constant 3.200000e+01 : f32
    %16 = vector.broadcast %cst_12 : f32 to vector<16x1xf32>
    %17 = arith.divf %15, %16 : vector<16x1xf32>
    %18 = vector.broadcast %17 : vector<16x1xf32> to vector<16x32xf32>
    %19 = arith.subf %9, %18 : vector<16x32xf32>
    %20 = arith.mulf %19, %19 : vector<16x32xf32>
    %cst_13 = arith.constant dense<0.000000e+00> : vector<16xf32>
    %21 = vector.multi_reduction <add>, %20, %cst_13 [1] : vector<16x32xf32> to vector<16xf32>
    %22 = vector.shape_cast %21 : vector<16xf32> to vector<16x1xf32>
    %cst_14 = arith.constant 3.200000e+01 : f32
    %23 = vector.broadcast %cst_14 : f32 to vector<16x1xf32>
    %24 = arith.divf %22, %23 : vector<16x1xf32>
    %cst_15 = arith.constant 9.99999974E-6 : f32
    %25 = vector.broadcast %cst_15 : f32 to vector<16x1xf32>
    %26 = arith.addf %24, %25 : vector<16x1xf32>
    %27 = math.rsqrt %26 : vector<16x1xf32>
    %28 = vector.broadcast %27 : vector<16x1xf32> to vector<16x32xf32>
    %29 = arith.mulf %19, %28 : vector<16x32xf32>
    %30 = vector.broadcast %11 : vector<1x32xf32> to vector<16x32xf32>
    %31 = arith.mulf %29, %30 : vector<16x32xf32>
    %32 = vector.broadcast %13 : vector<1x32xf32> to vector<16x32xf32>
    %33 = arith.addf %31, %32 : vector<16x32xf32>
    %34 = arith.truncf %33 : vector<16x32xf32> to vector<16x32xbf16>
    %c0_16 = arith.constant 0 : index
    %c0_17 = arith.constant 0 : index
    %c0_18 = arith.constant 0 : index
    %35 = vector.load %arg11[%c0_16, %c0_17, %c0_18] : memref<1x32x64xbf16, #tpu.memory_space<vmem>>, vector<1x32x64xbf16>
    %36 = vector.shape_cast %35 : vector<1x32x64xbf16> to vector<32x64xbf16>
    %cst_19 = arith.constant dense<0.000000e+00> : vector<16x64xf32>
    %37 = tpu.matmul %34, %36, %cst_19 {dimension_numbers = #tpu.dot_dimension_numbers<[1], [0], [0], [1], [0, 0, 1, 1], [], []>} : vector<16x32xbf16>, vector<32x64xbf16>, vector<16x64xf32> -> vector<16x64xf32>
    %c0_20 = arith.constant 0 : index
    %c0_21 = arith.constant 0 : index
    %c0_22 = arith.constant 0 : index
    %38 = vector.load %arg12[%c0_20, %c0_21, %c0_22] : memref<1x1x64xf32, #tpu.memory_space<vmem>>, vector<1x1x64xf32>
    %39 = vector.shape_cast %38 : vector<1x1x64xf32> to vector<1x64xf32>
    %40 = vector.broadcast %39 : vector<1x64xf32> to vector<16x64xf32>
    %41 = arith.addf %37, %40 : vector<16x64xf32>
    %cst_23 = arith.constant 5.000000e-01 : f32
    %42 = vector.broadcast %cst_23 : f32 to vector<16x64xf32>
    %43 = arith.mulf %42, %41 : vector<16x64xf32>
    %cst_24 = arith.constant 4.471500e-02 : f32
    %44 = vector.broadcast %cst_24 : f32 to vector<16x64xf32>
    %45 = arith.mulf %44, %41 : vector<16x64xf32>
    %46 = arith.mulf %45, %41 : vector<16x64xf32>
    %47 = arith.mulf %46, %41 : vector<16x64xf32>
    %48 = arith.addf %41, %47 : vector<16x64xf32>
    %cst_25 = arith.constant 0.797884583 : f32
    %49 = vector.broadcast %cst_25 : f32 to vector<16x64xf32>
    %50 = arith.mulf %49, %48 : vector<16x64xf32>
    %51 = math.tanh %50 : vector<16x64xf32>
    %cst_26 = arith.constant 1.000000e+00 : f32
    %52 = vector.broadcast %cst_26 : f32 to vector<16x64xf32>
    %53 = arith.addf %52, %51 : vector<16x64xf32>
    %54 = arith.mulf %43, %53 : vector<16x64xf32>
    %55 = arith.truncf %54 : vector<16x64xf32> to vector<16x64xbf16>
    %c0_27 = arith.constant 0 : index
    %c0_28 = arith.constant 0 : index
    %c0_29 = arith.constant 0 : index
    %56 = vector.load %arg13[%c0_27, %c0_28, %c0_29] : memref<1x64x32xbf16, #tpu.memory_space<vmem>>, vector<1x64x32xbf16>
    %57 = vector.shape_cast %56 : vector<1x64x32xbf16> to vector<64x32xbf16>
    %cst_30 = arith.constant dense<0.000000e+00> : vector<16x32xf32>
    %58 = tpu.matmul %55, %57, %cst_30 {dimension_numbers = #tpu.dot_dimension_numbers<[1], [0], [0], [1], [0, 0, 1, 1], [], []>} : vector<16x64xbf16>, vector<64x32xbf16>, vector<16x32xf32> -> vector<16x32xf32>
    %59 = arith.addf %9, %58 : vector<16x32xf32>
    %c0_31 = arith.constant 0 : index
    %c0_32 = arith.constant 0 : index
    %c0_33 = arith.constant 0 : index
    %60 = vector.load %arg14[%c0_31, %c0_32, %c0_33] : memref<1x1x32xf32, #tpu.memory_space<vmem>>, vector<1x1x32xf32>
    %61 = vector.shape_cast %60 : vector<1x1x32xf32> to vector<1x32xf32>
    %62 = vector.broadcast %61 : vector<1x32xf32> to vector<16x32xf32>
    %63 = arith.addf %59, %62 : vector<16x32xf32>
    %64 = arith.index_cast %7 : i32 to index
    %c0_34 = arith.constant 0 : index
    %65 = vector.load %arg21[%64, %c0_34] : memref<16x32xf32, #tpu.memory_space<vmem>>, vector<16x32xf32>
    tpu.vector_store %arg21[%64, %c0_34], %63 {strides = array<i32>} : memref<16x32xf32, #tpu.memory_space<vmem>>, vector<16x32xf32>,
    %c1_i32_35 = arith.constant 1 : i32
    %c1_i32_36 = arith.constant 1 : i32
    %66 = arith.cmpi eq, %arg1, %c1_i32_36 : i32
    %67 = arith.extui %66 : i1 to i32
    %c0_i32_37 = arith.constant 0 : i32
    %68 = arith.cmpi ne, %67, %c0_i32_37 : i32
    scf.if %68 {
      %c0_38 = arith.constant 0 : index
      %c0_39 = arith.constant 0 : index
      %69 = vector.load %arg21[%c0_38, %c0_39] : memref<16x32xf32, #tpu.memory_space<vmem>>, vector<16x32xf32>
      %c0_40 = arith.constant 0 : index
      %c0_41 = arith.constant 0 : index
      %70 = vector.load %arg16[%c0_40, %c0_41] : memref<1x32xf32, #tpu.memory_space<vmem>>, vector<1x32xf32>
      %c0_42 = arith.constant 0 : index
      %c0_43 = arith.constant 0 : index
      %71 = vector.load %arg17[%c0_42, %c0_43] : memref<1x32xf32, #tpu.memory_space<vmem>>, vector<1x32xf32>
      %cst_44 = arith.constant dense<0.000000e+00> : vector<16xf32>
      %72 = vector.multi_reduction <add>, %69, %cst_44 [1] : vector<16x32xf32> to vector<16xf32>
      %73 = vector.shape_cast %72 : vector<16xf32> to vector<16x1xf32>
      %cst_45 = arith.constant 3.200000e+01 : f32
      %74 = vector.broadcast %cst_45 : f32 to vector<16x1xf32>
      %75 = arith.divf %73, %74 : vector<16x1xf32>
      %76 = vector.broadcast %75 : vector<16x1xf32> to vector<16x32xf32>
      %77 = arith.subf %69, %76 : vector<16x32xf32>
      %78 = arith.mulf %77, %77 : vector<16x32xf32>
      %cst_46 = arith.constant dense<0.000000e+00> : vector<16xf32>
      %79 = vector.multi_reduction <add>, %78, %cst_46 [1] : vector<16x32xf32> to vector<16xf32>
      %80 = vector.shape_cast %79 : vector<16xf32> to vector<16x1xf32>
      %cst_47 = arith.constant 3.200000e+01 : f32
      %81 = vector.broadcast %cst_47 : f32 to vector<16x1xf32>
      %82 = arith.divf %80, %81 : vector<16x1xf32>
      %cst_48 = arith.constant 9.99999974E-6 : f32
      %83 = vector.broadcast %cst_48 : f32 to vector<16x1xf32>
      %84 = arith.addf %82, %83 : vector<16x1xf32>
      %85 = math.rsqrt %84 : vector<16x1xf32>
      %86 = vector.broadcast %85 : vector<16x1xf32> to vector<16x32xf32>
      %87 = arith.mulf %77, %86 : vector<16x32xf32>
      %88 = vector.broadcast %70 : vector<1x32xf32> to vector<16x32xf32>
      %89 = arith.mulf %87, %88 : vector<16x32xf32>
      %90 = vector.broadcast %71 : vector<1x32xf32> to vector<16x32xf32>
      %91 = arith.addf %89, %90 : vector<16x32xf32>
      %c0_49 = arith.constant 0 : index
      %c0_50 = arith.constant 0 : index
      %92 = vector.load %arg15[%c0_49, %c0_50] : memref<2x16xf32, #tpu.memory_space<vmem>>, vector<2x16xf32>
      %cst_51 = arith.constant dense<0.000000e+00> : vector<2x32xf32>
      %93 = tpu.matmul %92, %91, %cst_51 {dimension_numbers = #tpu.dot_dimension_numbers<[1], [0], [0], [1], [0, 0, 1, 1], [], []>} : vector<2x16xf32>, vector<16x32xf32>, vector<2x32xf32> -> vector<2x32xf32>
      %c0_52 = arith.constant 0 : index
      %c0_53 = arith.constant 0 : index
      %94 = vector.load %arg18[%c0_52, %c0_53] : memref<32x128xf32, #tpu.memory_space<vmem>>, vector<32x128xf32>
      %cst_54 = arith.constant dense<0.000000e+00> : vector<2x128xf32>
      %95 = tpu.matmul %93, %94, %cst_54 {dimension_numbers = #tpu.dot_dimension_numbers<[1], [0], [0], [1], [0, 0, 1, 1], [], []>} : vector<2x32xf32>, vector<32x128xf32>, vector<2x128xf32> -> vector<2x128xf32>
      %c0_55 = arith.constant 0 : index
      %c0_56 = arith.constant 0 : index
      %96 = vector.load %arg19[%c0_55, %c0_56] : memref<1x128xf32, #tpu.memory_space<vmem>>, vector<1x128xf32>
      %97 = vector.broadcast %96 : vector<1x128xf32> to vector<2x128xf32>
      %98 = arith.addf %95, %97 : vector<2x128xf32>
      %c0_57 = arith.constant 0 : index
      %c0_58 = arith.constant 0 : index
      %99 = vector.load %arg20[%c0_57, %c0_58] : memref<2x128xf32, #tpu.memory_space<vmem>>, vector<2x128xf32>
      tpu.vector_store %arg20[%c0_57, %c0_58], %98 {strides = array<i32>} : memref<2x128xf32, #tpu.memory_space<vmem>>, vector<2x128xf32>,
    } else {
    }
    return
  }
  func.func @transform_0(%arg0: i32, %arg1: i32) -> (i32, i32) {
    %c0_i32 = arith.constant 0 : i32
    %c0_i32_0 = arith.constant 0 : i32
    return %arg0, %c0_i32 : i32, i32
  }
  func.func @transform_1(%arg0: i32, %arg1: i32) -> (i32, i32, i32) {
    %c0_i32 = arith.constant 0 : i32
    %c0_i32_0 = arith.constant 0 : i32
    %c0_i32_1 = arith.constant 0 : i32
    return %arg1, %c0_i32, %c0_i32_0 : i32, i32, i32
  }
  func.func @transform_2(%arg0: i32, %arg1: i32) -> (i32, i32, i32) {
    %c0_i32 = arith.constant 0 : i32
    %c0_i32_0 = arith.constant 0 : i32
    %c0_i32_1 = arith.constant 0 : i32
    return %arg1, %c0_i32, %c0_i32_0 : i32, i32, i32
  }
  func.func @transform_3(%arg0: i32, %arg1: i32) -> (i32, i32, i32) {
    %c0_i32 = arith.constant 0 : i32
    %c0_i32_0 = arith.constant 0 : i32
    %c0_i32_1 = arith.constant 0 : i32
    return %arg1, %c0_i32, %c0_i32_0 : i32, i32, i32
  }
  func.func @transform_4(%arg0: i32, %arg1: i32) -> (i32, i32, i32) {
    %c0_i32 = arith.constant 0 : i32
    %c0_i32_0 = arith.constant 0 : i32
    %c0_i32_1 = arith.constant 0 : i32
    return %arg1, %c0_i32, %c0_i32_0 : i32, i32, i32
  }
  func.func @transform_5(%arg0: i32, %arg1: i32) -> (i32, i32, i32) {
    %c0_i32 = arith.constant 0 : i32
    %c0_i32_0 = arith.constant 0 : i32
    %c0_i32_1 = arith.constant 0 : i32
    return %arg1, %c0_i32, %c0_i32_0 : i32, i32, i32
  }
  func.func @transform_6(%arg0: i32, %arg1: i32) -> (i32, i32, i32) {
    %c0_i32 = arith.constant 0 : i32
    %c0_i32_0 = arith.constant 0 : i32
    %c0_i32_1 = arith.constant 0 : i32
    return %arg1, %c0_i32, %c0_i32_0 : i32, i32, i32
  }
  func.func @transform_7(%arg0: i32, %arg1: i32) -> (i32, i32, i32) {
    %c0_i32 = arith.constant 0 : i32
    %c0_i32_0 = arith.constant 0 : i32
    %c0_i32_1 = arith.constant 0 : i32
    return %arg1, %c0_i32, %c0_i32_0 : i32, i32, i32
  }
  func.func @transform_8(%arg0: i32, %arg1: i32) -> (i32, i32, i32) {
    %c0_i32 = arith.constant 0 : i32
    %c0_i32_0 = arith.constant 0 : i32
    %c0_i32_1 = arith.constant 0 : i32
    return %arg1, %c0_i32, %c0_i32_0 : i32, i32, i32
  }
  func.func @transform_9(%arg0: i32, %arg1: i32) -> (i32, i32, i32) {
    %c0_i32 = arith.constant 0 : i32
    %c0_i32_0 = arith.constant 0 : i32
    %c0_i32_1 = arith.constant 0 : i32
    return %arg1, %c0_i32, %c0_i32_0 : i32, i32, i32
  }
  func.func @transform_10(%arg0: i32, %arg1: i32) -> (i32, i32, i32) {
    %c0_i32 = arith.constant 0 : i32
    %c0_i32_0 = arith.constant 0 : i32
    %c0_i32_1 = arith.constant 0 : i32
    return %arg1, %c0_i32, %c0_i32_0 : i32, i32, i32
  }
  func.func @transform_11(%arg0: i32, %arg1: i32) -> (i32, i32, i32) {
    %c0_i32 = arith.constant 0 : i32
    %c0_i32_0 = arith.constant 0 : i32
    %c0_i32_1 = arith.constant 0 : i32
    return %arg1, %c0_i32, %c0_i32_0 : i32, i32, i32
  }
  func.func @transform_12(%arg0: i32, %arg1: i32) -> (i32, i32, i32) {
    %c0_i32 = arith.constant 0 : i32
    %c0_i32_0 = arith.constant 0 : i32
    %c0_i32_1 = arith.constant 0 : i32
    return %arg1, %c0_i32, %c0_i32_0 : i32, i32, i32
  }
  func.func @transform_13(%arg0: i32, %arg1: i32) -> (i32, i32) {
    %c0_i32 = arith.constant 0 : i32
    %c0_i32_0 = arith.constant 0 : i32
    %c0_i32_1 = arith.constant 0 : i32
    return %c0_i32, %c0_i32_0 : i32, i32
  }
  func.func @transform_14(%arg0: i32, %arg1: i32) -> (i32, i32) {
    %c0_i32 = arith.constant 0 : i32
    %c0_i32_0 = arith.constant 0 : i32
    %c0_i32_1 = arith.constant 0 : i32
    return %c0_i32, %c0_i32_0 : i32, i32
  }
  func.func @transform_15(%arg0: i32, %arg1: i32) -> (i32, i32) {
    %c0_i32 = arith.constant 0 : i32
    %c0_i32_0 = arith.constant 0 : i32
    %c0_i32_1 = arith.constant 0 : i32
    return %c0_i32, %c0_i32_0 : i32, i32
  }
  func.func @transform_16(%arg0: i32, %arg1: i32) -> (i32, i32) {
    %c0_i32 = arith.constant 0 : i32
    %c0_i32_0 = arith.constant 0 : i32
    %c0_i32_1 = arith.constant 0 : i32
    return %c0_i32, %c0_i32_0 : i32, i32
  }
  func.func @transform_17(%arg0: i32, %arg1: i32) -> (i32, i32) {
    %c0_i32 = arith.constant 0 : i32
    %c0_i32_0 = arith.constant 0 : i32
    %c0_i32_1 = arith.constant 0 : i32
    return %c0_i32, %c0_i32_0 : i32, i32
  }
  func.func @transform_18(%arg0: i32, %arg1: i32) -> (i32, i32) {
    %c0_i32 = arith.constant 0 : i32
    %c0_i32_0 = arith.constant 0 : i32
    return %arg0, %c0_i32 : i32, i32
  }
}

</mosaic_0001>

<bundles_post_ra>
// kernel: tpu_custom_call.1
= control target key start
LH: loop header
LB: loop body
LE: loop exit
PB: predicated region body
PF: predicated region fallthrough
CT: control target
= control target key end

     0   :  { %s2205_s0 = inlined_call_operand.vmem [shape: f32[16,32], index: 0, kind: input, shape index: {}]   ;;  %s2206_s1 = inlined_call_operand.vmem [shape: f32[2,1,32], index: 1, kind: input, shape index: {}]   ;;  %s2207_s2 = inlined_call_operand.vmem [shape: f32[2,1,32], index: 2, kind: input, shape index: {}]   ;;  %s2208_s3 = inlined_call_operand.vmem [shape: bf16[2,16,8], index: 3, kind: input, shape index: {}]   ;;  %s2209_s4 = inlined_call_operand.vmem [shape: f32[2,16,1], index: 4, kind: input, shape index: {}]   ;;  %s2210_s5 = inlined_call_operand.vmem [shape: bf16[2,8,16], index: 5, kind: input, shape index: {}]   ;;  %s2211_s6 = inlined_call_operand.vmem [shape: f32[2,8,1], index: 6, kind: input, shape index: {}]   ;;  %s2212_s7 = inlined_call_operand.vmem [shape: f32[2,1,32], index: 7, kind: input, shape index: {}]   ;;  %s2213_s8 = inlined_call_operand.vmem [shape: f32[2,1,32], index: 8, kind: input, shape index: {}]   ;;  %s2214_s9 = inlined_call_operand.vmem [shape: bf16[2,32,64], index: 9, kind: input, shape index: {}]   ;;  %s2215_s10 = inlined_call_operand.vmem [shape: f32[2,1,64], index: 10, kind: input, shape index: {}]   ;;  %s2216_s11 = inlined_call_operand.vmem [shape: bf16[2,64,32], index: 11, kind: input, shape index: {}]   ;;  %s2217_s12 = inlined_call_operand.vmem [shape: f32[2,1,32], index: 12, kind: input, shape index: {}]   ;;  %s2218_s13 = inlined_call_operand.vmem [shape: f32[2,16], index: 13, kind: input, shape index: {}]   ;;  %s2219_s14 = inlined_call_operand.vmem [shape: f32[1,32], index: 14, kind: input, shape index: {}]   ;;  %s2220_s15 = inlined_call_operand.vmem [shape: f32[1,32], index: 15, kind: input, shape index: {}]   ;;  %s2221_s16 = inlined_call_operand.vmem [shape: f32[32,128], index: 16, kind: input, shape index: {}]   ;;  %s2222_s17 = inlined_call_operand.vmem [shape: f32[1,128], index: 17, kind: input, shape index: {}]   ;;  %s2223_s18 = inlined_call_operand.hbm [shape: f32[2,128], index: 18, kind: output, shape index: {}]  }
   0x1   :  { %2228 = sst [smem:[#allocation9_spill]] %s2205_s0 }
   0x2   :  { %2229 = sst [smem:[#allocation10_spill]] %s2206_s1 }
   0x3   :  { %2230 = sst [smem:[#allocation11_spill]] %s2207_s2 }
   0x4   :  { %2231 = sst [smem:[#allocation12_spill]] %s2208_s3 }
   0x5   :  { %2232 = sst [smem:[#allocation13_spill]] %s2209_s4 }
   0x6   :  { %2233 = sst [smem:[#allocation14_spill]] %s2210_s5 }
   0x7   :  { %2234 = sst [smem:[#allocation15_spill]] %s2218_s13 }
   0x8   :  { %2235 = sst [smem:[#allocation16_spill]] %s2219_s14 }
   0x9   :  { %2236 = sst [smem:[#allocation17_spill]] %s2220_s15 }
   0xa   :  { %2237 = sst [smem:[#allocation18_spill]] %s2222_s17 }
   0xb   :  { %2238 = sst [smem:[#allocation19_spill]] %s2223_s18 }
   0xc   :  { %23 = vsyncpa [#allocation4], 0  ;;  %s1967_s27 = smov 0   ;;  %s1969_s28 = smov 0  }
   0xd   :  { %s1971_s29 = smov 0  }
   0xe LB: > { %2239 = sst [smem:[#allocation6_spill]] %s1853_s28  ;;  %s38_s0 = sadd.s32 1, %s1853_s28  ;;  %s1857_s29 = sphi %s1971_s29, %s29_s29   ;;  %s1853_s28 = sphi %s1969_s28, %s2262_s28   ;;  %s1849_s27 = sphi %s1967_s27, %s2261_s27  }
   0xf   : > { %2240 = sst [smem:[#allocation7_spill]] %s1857_s29  ;;  %p39_p0 = scmp.ge.s32.totalorder %s38_s0, 2 }
  0x10   : > { %p1604_p1 = scmp.ge.s32.totalorder %s1857_s29, 1  ;;  %p632_p2 = scmp.lt.s32.totalorder %s1857_s29, 3 }
  0x11   : > { %s2264_s0 = smov (%p39_p0, %s38_s0), 0 }
  0x12   : > { %2241 = sst [smem:[#allocation8_spill]] %s2264_s0  ;;  %p633_p3 = pnand %p1604_p1, %p632_p2 }
  0x13   : > { %p733_p4 = scmp.lt.s32.totalorder (!%p633_p3), %s1849_s27, 1  ;;  %s2244_s3 = sld [smem:[#allocation12_spill]] (!%p633_p3) }
  0x14   : > { %636 = sbr.rel (%p633_p3) target bundleno = 2406 (0x966), region = 92  ;;  %s2245_s4 = sld [smem:[#allocation13_spill]] (!%p633_p3) }
  0x15   : > { %s2246_s5 = sld [smem:[#allocation14_spill]] (!%p633_p3)  ;;  %p1615_p5 = scmp.ne.s32.totalorder (!%p633_p3), %s1849_s27, 0 }
  0x1b   : > { %s1990_s19 = scalar_select %p733_p4, %s1849_s27, 1 }
  0x1c   : > { %s2247_s22 = sld [smem:[#allocation9_spill]] (!%p1615_p5)  ;;  %vm786_vm0 = vcmask (!%p1615_p5), 261120  }
  0x1d   : > { %s1644_s26 = sshll.u32 %s1990_s19, 3  ;;  %s1645_s30 = sshll.u32 %s1990_s19, 4 }
  0x1e   : > { %s2005_s1 = scalar_lea.vmem %s2244_s3, %s1644_s26  ;;  %s2010_s29 = scalar_lea.vmem %s2245_s4, %s1645_s30 }
  0x1f   : > { %s1609_s17 = sshll.u32 %s1990_s19, 2  ;;  %s2016_s21 = scalar_lea.vmem %s2211_s6, %s1644_s26 }
  0x20   : > { %s2021_s24 = scalar_lea.vmem %s2246_s5, %s1609_s17  ;;  %s759_s0 = scalar_lea.vmem %s2212_s7, %s1990_s19 }
  0x21   : > { %s762_s18 = scalar_lea.vmem %s2213_s8, %s1990_s19  ;;  %s2034_s14 = scalar_lea.vmem %s2214_s9, %s1645_s30 }
  0x22   : > { %s770_s26 = scalar_lea.vmem %s2215_s10, %s1990_s19  ;;  %s1647_s2 = sshll.u32 %s1990_s19, 5  ;;  %v784_v0 = vld [vmem:[%s2247_s22] sm:$0xff] (!%p1615_p5)  ;;  %v785_v1 = vld [vmem:[%s2247_s22 + $0x8] sm:$0xff] (!%p1615_p5) }
  0x23   : > { %s2044_s5 = scalar_lea.vmem %s2216_s11, %s1647_s2  ;;  %s778_s3 = scalar_lea.vmem %s2217_s12, %s1990_s19  ;;  %787 = vst.msk [vmem:[#allocation2] sm:$0xff] (!%p1615_p5), %vm786_vm0, %v784_v0  ;;  %788 = vst.msk [vmem:[#allocation2 + $0x8] sm:$0xff] (!%p1615_p5), %vm786_vm0, %v785_v1 }
  0x24   : > { %783 = sbr.rel (%p1615_p5) target bundleno = 43 (0x2b), region = 96 }
  0x2b PF: > { %s2057_s15 = smov 0  }
  0x2c LB: >> { %s1616_s2 = sshll.u32 %s1861_s15, 3  ;;  %vm800_vm1 = vcmask 261120   ;;  %v1863_v9 = vmov 0.0   ;;  %vm1864_vm2 = vmmov 0   ;;  %v832_v10 = vld [vmem:[%s2010_s29] sm:$0xff]  ;;  %v1865_v11 = vmov 0   ;;  %s1861_s15 = sphi %s2057_s15, %s794_s15  }
  0x2d   : >> { %s2063_s17 = scalar_lea.vmem [#allocation2], %s1616_s2  ;;  %1668 = vmatprep.subr.bf16.mxu0 %v1863_v9  ;;  %1674 = vmatprep.subr.bf16.mxu1 %v1863_v9  ;;  %v833_v12 = vld [vmem:[%s2010_s29 + $0x8] sm:$0xff]  ;;  %s2248_s28 = sld [smem:[#allocation10_spill]]  ;;  %vm853_vm3 = vcmask 1043456   ;;  %v1776_v24 = vld [vmem:[%s2005_s1] sm:$0xff]   ;;  %vm849_vm4 = vcmask 64512  }
  0x2e   : >> { %v2066_v2 = vld [vmem:[%s2063_s17] sm:$0xff]  ;;  %1670 = vmatprep.mubr.msk.bf16.mxu0 %vm1864_vm2, %v1863_v9  ;;  %1676 = vmatprep.mubr.msk.bf16.mxu1 %vm1864_vm2, %v1863_v9  ;;  %s2250_s13 = sld [smem:[#allocation11_spill]]  ;;  %vm924_vm5 = vcmask 130048   ;;  %s794_s15 = sadd.s32 1, %s1861_s15  }
  0x2f   : >> { %v801_v3 = vsel %vm800_vm1, %v2066_v2, 0.0  ;;  %1774 = vset.pattern.permute.xlu1 %v1865_v11  ;;  %1775 = vset.pattern.permute.xlu0 %v1865_v11  ;;  %v918_v25 = vld [vmem:[%s2016_s21] sm:$0xff]  ;;  %p791_p6 = scmp.ge.s32.totalorder %s794_s15, 2  }
  0x30   : >> { %802 = vadd.xlane.f32.xlu0 %v801_v3  ;;  %836 = vperm.xlu1 %1774, %v832_v10   ;;  %v916_v53 = vld [vmem:[%s2021_s24] sm:$0xf]  ;;  %vm1867_vm6 = vmmov (%p791_p6), 0   ;;  %vm1137_vm7 = vcmask (%p791_p6), 523264   ;;  %p1634_p7 = scmp.ne.s32.totalorder (%p791_p6), %s1849_s27, 1 }
  0x31   : > { %v1783_v11 = vld [vmem:[%s2034_s14] sm:$0xff] (%p791_p6)  }
  0x33   : >> { %s2249_s4 = scalar_lea.vmem %s2248_s28, %s1990_s19 }
  0x34   : >> { %841 = vperm.xlu1 %1774, %v833_v12   ;;  %v1617_v17 = vld [vmem:[%s2249_s4] ss:$0 sm:$0xff]  ;;  %s2251_s2 = scalar_lea.vmem %s2250_s13, %s1990_s19  ;;  %v1866_v12 = vmov (%p791_p6), 0.0  }
  0x35   : >> { %v1618_v19 = vld [vmem:[%s2251_s2] ss:$0 sm:$0xff] }
  0xaf   : >> { %v837_v26 = vpop.permute.xlu1 %836 }
  0xb3   : >> { %v842_v30 = vpop.permute.xlu1 %841 }
  0xbd   : >> { %v803_v4 = vpop.xlane.xlu0 %802 }
  0xbe   : >> { %v805_v5 = vmul.f32 0.03125, %v803_v4 }
  0xc0   : >> { %v806_v6 = vsub.f32 %v2066_v2, %v805_v5 }
  0xc2   : >> { %v807_v7 = vmul.f32 %v806_v6, %v806_v6 }
  0xc4   : >> { %v808_v8 = vsel %vm800_vm1, %v807_v7, 0.0 }
  0xc5   : >> { %809 = vadd.xlane.f32.xlu0 %v808_v8 }
  0xdb   : >> { %921 = vperm.xlu0 %1775, %v918_v25  }
 0x152   : >> { %v810_v13 = vpop.xlane.xlu0 %809 }
 0x153   : >> { %v811_v14 = vmul.f32 0.03125, %v810_v13  ;;  %v1784_v13 = vld [vmem:[%s2034_s14 + $0x8] sm:$0xff] (%p791_p6)  }
 0x155   : >> { %v812_v15 = vadd.f32 1e-05, %v811_v14 }
 0x157   : >> { %1777 = vrsqrt.f32 %v812_v15 }
 0x15a   : >> { %v922_v54 = vpop.permute.xlu0 %921 }
 0x161   : >> { %v1778_v16 = vpop.eup %1777 }
 0x162   : >> { %v814_v18 = vmul.f32 %v1778_v16, %v806_v6 }
 0x164   : >> { %v821_v20 = vmul.f32 %v1617_v17, %v814_v18 }
 0x166   : >> { %v828_v21 = vadd.f32 %v1618_v19, %v821_v20 }
 0x168   : >> { %v829_v22 = vpack.c.bf16 %v828_v21, %v828_v21 }
 0x16a   : >> { %v855_v23 = vsel %vm853_vm3, %v829_v22, 0  ;;  %v1622_v22 = vld [vmem:[%s759_s0] ss:$0 sm:$0xff] (%p791_p6) }
 0x16b   : >> { %1669 = vmatpush3.bf16.msra.mxu0 %v855_v23 }
 0x16c   : > { %1680 = vmatprep.subr.bf16.mxu0 (%p791_p6), %v1866_v12 }
 0x16e   : >> { %1671 = vmatmul.mubr.msk.bf16.vlgmr.msra.gmra.mrb[0].mxu0 %vm849_vm4, %v1776_v24 }
 0x16f   : > { %1684 = vmatprep.mubr.msk.bf16.mxu0 (%p791_p6), %vm1867_vm6, %v1866_v12  ;;  %1681 = vmatpush3.bf16.msra.mxu0 (%p791_p6), %v1783_v11 }
 0x170   : > { %1682 = vmatprep.subr.bf16.mxu0 (%p791_p6), %v1866_v12 }
 0x173   : > { %1683 = vmatpush3.bf16.msra.mxu0 (%p791_p6), %v1784_v13 }
 0x241   : >> { %v891_v27 = vpop.f32.mrb[0].mxu0 }
 0x242   : >> { %v892_v28 = vadd.f32 %v891_v27, %v837_v26  ;;  %v1672_v29 = vpop.f32.mrb[1].mxu0  ;;  %v1623_v26 = vld [vmem:[%s762_s18] ss:$0 sm:$0xff] (%p791_p6) }
 0x243   : >> { %v894_v31 = vpop.f32.mrb[2].mxu0 }
 0x244   : >> { %v900_v32 = vmul.f32 0.044715, %v892_v28  ;;  %v895_v33 = vadd.f32 %v894_v31, %v842_v30  ;;  %v1673_v34 = vpop.f32.mrb[3].mxu0  ;;  %v898_v47 = vmul.f32 0.5, %v892_v28  ;;  %v1785_v31 = vld [vmem:[%s2044_s5] sm:$0xff] (%p791_p6)  }
 0x245   : > { %v1788_v34 = vld [vmem:[%s2044_s5 + $0x18] sm:$0xff] (%p791_p6)  }
 0x246   : >> { %v902_v35 = vmul.f32 %v900_v32, %v892_v28  ;;  %v901_v36 = vmul.f32 0.044715, %v895_v33  ;;  %v899_v48 = vmul.f32 0.5, %v895_v33  ;;  %v1786_v32 = vld [vmem:[%s2044_s5 + $0x8] sm:$0xff] (%p791_p6)  }
 0x248   : >> { %v903_v37 = vmul.f32 %v901_v36, %v895_v33  ;;  %v904_v38 = vmul.f32 %v902_v35, %v892_v28  ;;  %v1624_v35 = vld [vmem:[%s770_s26] ss:$0 sm:$0xff] (%p791_p6) }
 0x24a   : >> { %v905_v39 = vmul.f32 %v903_v37, %v895_v33  ;;  %v906_v40 = vadd.f32 %v904_v38, %v892_v28 }
 0x24c   : >> { %v907_v41 = vadd.f32 %v905_v39, %v895_v33  ;;  %v908_v42 = vmul.f32 0.7978846, %v906_v40  ;;  %v1787_v33 = vld [vmem:[%s2044_s5 + $0x10] sm:$0xff] (%p791_p6)  }
 0x24e   : >> { %v909_v43 = vmul.f32 0.7978846, %v907_v41  ;;  %1779 = vtanh.f32 %v908_v42 }
 0x250   : >> { %1781 = vtanh.f32 %v909_v43 }
 0x258   : >> { %v1780_v44 = vpop.eup %1779 }
 0x259   : >> { %v912_v45 = vadd.f32 1.0, %v1780_v44 }
 0x25a   : >> { %v1782_v46 = vpop.eup %1781 }
 0x25b   : >> { %v913_v49 = vadd.f32 1.0, %v1782_v46  ;;  %v914_v50 = vmul.f32 %v912_v45, %v898_v47 }
 0x25d   : >> { %v915_v51 = vmul.f32 %v913_v49, %v899_v48 }
 0x25f   : >> { %v917_v52 = vpack.c.bf16 %v915_v51, %v914_v50 }
 0x261   : >> { %1675 = vmatpush3.bf16.msra.mxu1 %v917_v52 }
 0x262   : > { %1688 = vmatprep.subr.bf16.mxu1 (%p791_p6), %v1866_v12 }
 0x264   : >> { %1677 = vmatmul.mubr.msk.bf16.vlgmr.msra.gmra.mrb[0].mxu1 %vm924_vm5, %v916_v53 }
 0x265   : > { %1696 = vmatprep.mubr.msk.bf16.mxu1 (%p791_p6), %vm1867_vm6, %v1866_v12  ;;  %1689 = vmatpush3.bf16.msra.mxu1 (%p791_p6), %v1785_v31 }
 0x266   : > { %1690 = vmatprep.subr.bf16.mxu1 (%p791_p6), %v1866_v12 }
 0x269   : > { %1691 = vmatpush3.bf16.msra.mxu1 (%p791_p6), %v1786_v32 }
 0x26a   : > { %1692 = vmatprep.subr.bf16.mxu1 (%p791_p6), %v1866_v12 }
 0x26d   : > { %1693 = vmatpush3.bf16.msra.mxu1 (%p791_p6), %v1787_v33 }
 0x26e   : > { %1694 = vmatprep.subr.bf16.mxu1 (%p791_p6), %v1866_v12 }
 0x271   : > { %1695 = vmatpush3.bf16.msra.mxu1 (%p791_p6), %v1788_v34 }
 0x336   : > { %793 = sbr.rel (!%p791_p6) target bundleno = 44 (0x2c), region = 172 }
 0x337   : >> { %v962_v55 = vpop.f32.mrb[0].mxu1 }
 0x338   : >> { %v963_v56 = vadd.f32 %v962_v55, %v922_v54  ;;  %v1678_v57 = vpop.f32.mrb[1].mxu1 }
 0x339   : >> { %v965_v58 = vpop.f32.mrb[2].mxu1 }
 0x33a   : >> { %v968_v59 = vadd.f32 %v963_v56, %v2066_v2  ;;  %v1679_v60 = vpop.f32.mrb[3].mxu1 }
 0x33c   : >> { %969 = vst.msk [vmem:[%s2063_s17] sm:$0xff] %vm800_vm1, %v968_v59 }
 0x33d   : > { %vm1869_vm8 = vmmov (!%p1634_p7), 0   ;;  %s2252_s30 = sld [smem:[#allocation16_spill]] (!%p1634_p7)  ;;  %s2253_s2 = sld [smem:[#allocation17_spill]] (!%p1634_p7) }
 0x33e   : > { %s2254_s14 = sld [smem:[#allocation15_spill]] (!%p1634_p7)  ;;  %s2255_s0 = sld [smem:[#allocation18_spill]] (!%p1634_p7) }
 0x343   : > { %v2094_v61 = vld [vmem:[#allocation2] sm:$0xff]  ;;  %v2096_v62 = vld [vmem:[#allocation2 + $0x8] sm:$0xff] }
 0x344   : > { %v975_v63 = vsel %vm800_vm1, %v2094_v61, 0.0  ;;  %v978_v0 = vsel %vm800_vm1, %v2096_v62, 0.0 }
 0x345   : > { %976 = vadd.xlane.f32.xlu0 %v975_v63 }
 0x349   : > { %979 = vadd.xlane.f32.xlu0 %v978_v0  ;;  %v1633_v0 = vld [vmem:[%s778_s3] ss:$0 sm:$0xff] }
 0x3d2   : > { %v977_v1 = vpop.xlane.xlu0 %976 }
 0x3d3   : > { %v982_v2 = vmul.f32 0.03125, %v977_v1 }
 0x3d5   : > { %v984_v3 = vsub.f32 %v2094_v61, %v982_v2 }
 0x3d6   : > { %v980_v4 = vpop.xlane.xlu0 %979 }
 0x3d7   : > { %v983_v5 = vmul.f32 0.03125, %v980_v4  ;;  %v986_v6 = vmul.f32 %v984_v3, %v984_v3 }
 0x3d9   : > { %v985_v7 = vsub.f32 %v2096_v62, %v983_v5  ;;  %v988_v8 = vsel %vm800_vm1, %v986_v6, 0.0 }
 0x3da   : > { %989 = vadd.xlane.f32.xlu1 %v988_v8 }
 0x3db   : > { %v987_v9 = vmul.f32 %v985_v7, %v985_v7 }
 0x3dd   : > { %v991_v10 = vsel %vm800_vm1, %v987_v9, 0.0 }
 0x3de   : > { %992 = vadd.xlane.f32.xlu1 %v991_v10 }
 0x467   : > { %v990_v14 = vpop.xlane.xlu1 %989 }
 0x468   : > { %v994_v15 = vmul.f32 0.03125, %v990_v14 }
 0x46a   : > { %v996_v16 = vadd.f32 1e-05, %v994_v15 }
 0x46b   : > { %v993_v17 = vpop.xlane.xlu1 %992 }
 0x46c   : > { %1789 = vrsqrt.f32 %v996_v16  ;;  %v995_v18 = vmul.f32 0.03125, %v993_v17 }
 0x46e   : > { %v997_v19 = vadd.f32 1e-05, %v995_v18 }
 0x470   : > { %1791 = vrsqrt.f32 %v997_v19 }
 0x476   : > { %v1790_v20 = vpop.eup %1789 }
 0x477   : > { %v1000_v21 = vmul.f32 %v1790_v20, %v984_v3  ;;  %v1868_v20 = vmov (!%p1634_p7), 0.0|0.0  }
 0x478   : > { %1718 = vmatprep.subr.bf16.mxu0 (!%p1634_p7), %v1868_v20  ;;  %1721 = vmatprep.subr.bf16.mxu1 (!%p1634_p7), %v1868_v20 }
 0x479   : > { %v1008_v25 = vmul.f32 %v1622_v22, %v1000_v21  ;;  %v1870_v21 = vmov (!%p1634_p7), 0.0  }
 0x47a   : > { %v1792_v23 = vpop.eup %1791 }
 0x47b   : > { %v1001_v24 = vmul.f32 %v1792_v23, %v985_v7  ;;  %v1016_v28 = vadd.f32 %v1623_v26, %v1008_v25  ;;  %v1321_v23 = vld [vmem:[%s2221_s16 + $0x8] sm:$0xff] (!%p1634_p7) }
 0x47d   : > { %v1009_v27 = vmul.f32 %v1622_v22, %v1001_v24  ;;  %v1320_v22 = vld [vmem:[%s2221_s16] sm:$0xff] (!%p1634_p7)  ;;  %v1322_v24 = vld [vmem:[%s2221_s16 + $0x10] sm:$0xff] (!%p1634_p7) }
 0x47e   : > { %v1722_v25 = vpack.c.bf16 (!%p1634_p7), %v1321_v23, %v1320_v22 }
 0x47f   : > { %v1017_v29 = vadd.f32 %v1623_v26, %v1009_v27  ;;  %v1323_v26 = vld [vmem:[%s2221_s16 + $0x18] sm:$0xff] (!%p1634_p7) }
 0x480   : > { %v1725_v27 = vpack.c.bf16 (!%p1634_p7), %v1323_v26, %v1322_v24 }
 0x481   : > { %v1018_v30 = vpack.c.bf16 %v1017_v29, %v1016_v28 }
 0x483   : > { %1685 = vmatmul.mubr.msk.bf16.vlgmr.msra.gmra.mrb[0].mxu0 %vm800_vm1, %v1018_v30 }
 0x484   : > { %1704 = vmatprep.mubr.msk.f32.mxu0 (!%p1634_p7), %vm1869_vm8, %v1870_v21 }
 0x556   : > { %v1079_v36 = vpop.f32.mrb[0].mxu0 }
 0x557   : > { %v1080_v37 = vadd.f32 %v1624_v35, %v1079_v36  ;;  %v1686_v38 = vpop.f32.mrb[1].mxu0  ;;  %v1635_v36 = vld [vmem:[%s2252_s30] ss:$0 sm:$0xff] (!%p1634_p7) }
 0x558   : > { %v1082_v39 = vpop.f32.mrb[2].mxu0 }
 0x559   : > { %v1088_v40 = vmul.f32 0.044715, %v1080_v37  ;;  %v1083_v41 = vadd.f32 %v1624_v35, %v1082_v39  ;;  %v1687_v42 = vpop.f32.mrb[3].mxu0  ;;  %v1086_v55 = vmul.f32 0.5, %v1080_v37 }
 0x55b   : > { %v1090_v43 = vmul.f32 %v1088_v40, %v1080_v37  ;;  %v1089_v44 = vmul.f32 0.044715, %v1083_v41  ;;  %v1087_v56 = vmul.f32 0.5, %v1083_v41  ;;  %v1636_v40 = vld [vmem:[%s2253_s2] ss:$0 sm:$0xff] (!%p1634_p7) }
 0x55d   : > { %v1092_v45 = vmul.f32 %v1090_v43, %v1080_v37  ;;  %v1091_v46 = vmul.f32 %v1089_v44, %v1083_v41 }
 0x55f   : > { %v1094_v47 = vadd.f32 %v1092_v45, %v1080_v37  ;;  %v1093_v48 = vmul.f32 %v1091_v46, %v1083_v41  ;;  %v1245_v45 = vld [vmem:[%s2254_s14] sm:$0x3] (!%p1634_p7) }
 0x561   : > { %v1096_v49 = vmul.f32 0.7978846, %v1094_v47  ;;  %v1095_v50 = vadd.f32 %v1093_v48, %v1083_v41  ;;  %v1638_v48 = vld [vmem:[%s2255_s0] ss:$0 sm:$0xff] (!%p1634_p7) }
 0x563   : > { %1793 = vtanh.f32 %v1096_v49  ;;  %v1097_v51 = vmul.f32 0.7978846, %v1095_v50 }
 0x565   : > { %1795 = vtanh.f32 %v1097_v51 }
 0x56d   : > { %v1794_v52 = vpop.eup %1793 }
 0x56e   : > { %v1100_v53 = vadd.f32 1.0, %v1794_v52 }
 0x56f   : > { %v1796_v54 = vpop.eup %1795 }
 0x570   : > { %v1101_v57 = vadd.f32 1.0, %v1796_v54  ;;  %v1102_v58 = vmul.f32 %v1100_v53, %v1086_v55 }
 0x572   : > { %v1103_v59 = vmul.f32 %v1101_v57, %v1087_v56 }
 0x574   : > { %v1104_v60 = vpack.c.bf16 %v1103_v59, %v1102_v58 }
 0x576   : > { %1697 = vmatmul.mubr.msk.bf16.vlgmr.msra.gmra.mrb[0].mxu1 %vm1137_vm7, %v1104_v60 }
 0x577   : > { %1715 = vmatprep.mubr.msk.f32.mxu1 (!%p1634_p7), %vm1869_vm8, %v1870_v21  ;;  %1723 = vmatpush3.bf16.msra.mxu1 (!%p1634_p7), %v1722_v25 }
 0x578   : > { %1724 = vmatprep.subr.bf16.mxu1 (!%p1634_p7), %v1868_v20 }
 0x57b   : > { %1726 = vmatpush3.bf16.msra.mxu1 (!%p1634_p7), %v1725_v27 }
 0x649   : > { %v1175_v63 = vpop.f32.mrb[0].mxu1 }
 0x64a   : > { %v1182_v1 = vadd.f32 %v1175_v63, %v2094_v61  ;;  %v1698_v2 = vpop.f32.mrb[1].mxu1  ;;  %1198 = sbr.rel (%p1634_p7) target bundleno = 2371 (0x943), region = 107 }
 0x64b   : > { %v1178_v3 = vpop.f32.mrb[2].mxu1 }
 0x64c   : > { %v1191_v4 = vadd.f32 %v1633_v0, %v1182_v1  ;;  %v1183_v5 = vadd.f32 %v1178_v3, %v2096_v62  ;;  %v1699_v6 = vpop.f32.mrb[3].mxu1 }
 0x64e   : > { %1193 = vst.msk [vmem:[#allocation2] sm:$0xff] %vm800_vm1, %v1191_v4  ;;  %v1192_v7 = vadd.f32 %v1633_v0, %v1183_v5 }
 0x650   : > { %1194 = vst.msk [vmem:[#allocation2 + $0x8] sm:$0xff] %vm800_vm1, %v1192_v7 }
 0x655   : > { %v1199_v8 = vld [vmem:[#allocation2] sm:$0xff] }
 0x656   : > { %v1203_v10 = vsel %vm800_vm1, %v1199_v8, 0.0 }
 0x657   : > { %v1200_v9 = vld [vmem:[#allocation2 + $0x8] sm:$0xff]  ;;  %1204 = vadd.xlane.f32.xlu0 %v1203_v10 }
 0x658   : > { %v1206_v61 = vsel %vm800_vm1, %v1200_v9, 0.0 }
 0x65b   : > { %1207 = vadd.xlane.f32.xlu0 %v1206_v61 }
 0x6e4   : > { %v1205_v11 = vpop.xlane.xlu0 %1204 }
 0x6e5   : > { %v1209_v12 = vmul.f32 0.03125, %v1205_v11 }
 0x6e7   : > { %v1211_v62 = vsub.f32 %v1199_v8, %v1209_v12 }
 0x6e8   : > { %v1208_v13 = vpop.xlane.xlu0 %1207 }
 0x6e9   : > { %v1210_v14 = vmul.f32 0.03125, %v1208_v13  ;;  %v1213_v15 = vmul.f32 %v1211_v62, %v1211_v62 }
 0x6eb   : > { %v1212_v16 = vsub.f32 %v1200_v9, %v1210_v14  ;;  %v1215_v17 = vsel %vm800_vm1, %v1213_v15, 0.0 }
 0x6ec   : > { %1216 = vadd.xlane.f32.xlu1 %v1215_v17 }
 0x6ed   : > { %v1214_v18 = vmul.f32 %v1212_v16, %v1212_v16 }
 0x6ef   : > { %v1218_v19 = vsel %vm800_vm1, %v1214_v18, 0.0 }
 0x6f0   : > { %1219 = vadd.xlane.f32.xlu1 %v1218_v19 }
 0x779   : > { %v1217_v28 = vpop.xlane.xlu1 %1216 }
 0x77a   : > { %v1221_v29 = vmul.f32 0.03125, %v1217_v28 }
 0x77c   : > { %v1223_v30 = vadd.f32 1e-05, %v1221_v29 }
 0x77d   : > { %v1220_v31 = vpop.xlane.xlu1 %1219 }
 0x77e   : > { %1797 = vrsqrt.f32 %v1223_v30  ;;  %v1222_v32 = vmul.f32 0.03125, %v1220_v31 }
 0x780   : > { %v1224_v33 = vadd.f32 1e-05, %v1222_v32 }
 0x782   : > { %1799 = vrsqrt.f32 %v1224_v33 }
 0x788   : > { %v1798_v34 = vpop.eup %1797 }
 0x789   : > { %v1227_v35 = vmul.f32 %v1798_v34, %v1211_v62 }
 0x78b   : > { %v1235_v39 = vmul.f32 %v1635_v36, %v1227_v35 }
 0x78c   : > { %v1800_v37 = vpop.eup %1799 }
 0x78d   : > { %v1228_v38 = vmul.f32 %v1800_v37, %v1212_v16  ;;  %v1243_v42 = vadd.f32 %v1636_v40, %v1235_v39 }
 0x78f   : > { %v1236_v41 = vmul.f32 %v1635_v36, %v1228_v38 }
 0x791   : > { %v1244_v43 = vadd.f32 %v1636_v40, %v1236_v41 }
 0x793   : > { %v1719_v44 = vpack.c.bf16 %v1244_v43, %v1243_v42 }
 0x795   : > { %1720 = vmatpush3.bf16.msra.mxu0 %v1719_v44 }
 0x798   : > { %1705 = vmatmul.mubr.msk.f32.vlgmr.msra.gmra.mrb[0].mxu0 %vm924_vm5, %v1245_v45 }
 0x86b   : > { %v1316_v46 = vpop.f32.mrb[0].mxu0 }
 0x86c   : > { %v1706_v47 = vpop.f32.mrb[1].mxu0  ;;  %1716 = vmatmul.mubr.msk.f32.vlgmr.msra.gmra.mrb[0].mxu1 %vm800_vm1, %v1316_v46 }
 0x93f   : > { %v1400_v49 = vpop.f32.mrb[0].mxu1 }
 0x940   : > { %v1401_v50 = vadd.f32 %v1638_v48, %v1400_v49  ;;  %v1717_v51 = vpop.f32.mrb[1].mxu1 }
 0x942   : > { %1404 = vst [vmem:[#allocation3] sm:$0x3] %v1401_v50 }
 0x943 PF: > { %s2256_s5 = sld [smem:[#allocation7_spill]]  ;;  %s1871_s19 = smov [#allocation3]  }
 0x944   : > { %s1414_s26 = sshll.u32 %s1871_s19, 4  ;;  %s1415_s26 = int_to_ptr.vmem [resolvable:$true] %s1414_s26 }
 0x945   : > { %s1801_s3 = scalar_lea.vmem %s1415_s26, 32  ;;  %p1808_p12 = scmp.lt.s32.totalorder %s1415_s26, %s1415_s26 }
 0x946   : > { %p1802_p9 = scmp.ne.s32.totalorder %s1415_s26, %s1801_s3  ;;  %p1809_p13 = scmp.lt.s32.totalorder %s1801_s3, %s1801_s3 }
 0x948   : > { %p1810_p0 = por %p1809_p13, %p1808_p12 }
 0x949   : > { %s2257_s18 = sadd.s32 4294967295, %s2256_s5  }
 0x94a   : > { %p2170_p8 = scmp.eq.s32.totalorder %s2257_s18, 1 }
 0x94c   : > { %p1803_p10 = pnand %p1802_p9, %p2170_p8 }
 0x94e   : > { %p1804_p11 = pneg %p1803_p10 }
 0x950   : > { %p1811_p1 = pnand %p1810_p0, %p1804_p11 }
 0x952   : > { %1814 = shalt.err (!%p1811_p1)
}
 0x953   : > { %s2259_s23 = sld [smem:[#allocation19_spill]] }
 0x959   : > { %s1815_s25 = scalar_lea.hbm %s2259_s23, 32 }
 0x95a   : > { %p1816_p2 = scmp.ne.s32.totalorder %s2259_s23, %s1815_s25  ;;  %p1821_p5 = scmp.lt.u32.totalorder %s1815_s25, %s2259_s23 }
 0x95c   : > { %p1817_p3 = pnand %p1816_p2, %p2170_p8 }
 0x95e   : > { %p1818_p4 = pneg %p1817_p3 }
 0x960   : > { %p1823_p6 = pnand %p1821_p5, %p1818_p4 }
 0x962   : > { %1826 = shalt.err (!%p1823_p6)
}
 0x963   : > { %1728 = dma.vmem_to_hbm [thread:$0]  (%p2170_p8), %s1415_s26, 32, %s2259_s23, [#allocation4]  }
 0x964   : > { %1844 = dma.done.wait (%p2170_p8), [#allocation4], 32  }
 0x965   : > { %1846 = vsyncadd (%p2170_p8), [#allocation4], 4294967264 }
 0x966 PF: > { %s2260_s29 = sld [smem:[#allocation7_spill]]  ;;  %s2261_s27 = sld [smem:[#allocation6_spill]] }
 0x967   : > { %s2262_s28 = sld [smem:[#allocation8_spill]] }
 0x96c   : > { %s29_s29 = sadd.s32 1, %s2260_s29  }
 0x96d   : > { %p26_p7 = scmp.ge.s32.totalorder %s29_s29, 4  }
 0x96f   :  { %28 = sbr.rel (!%p26_p7) target bundleno = 14 (0xe), region = 183 }
 0x976   :  { %1427 = vsyncpa [#allocation4], 1 }
 0x977   :  { %1429 = vsyncpa [#allocation4 + $0x1], 1 }

</bundles_post_ra>
